<compile_context>
chip_gen: v5e
topology: v5e:2x2
jax: 0.10.0
libtpu: 0.0.40
codegen_flags: <defaults>
</compile_context>

<pallas_src>
import functools

import jax
import jax.numpy as jnp
from jax import lax
from jax.experimental import pallas as pl
from jax.experimental.pallas import tpu as pltpu


# ---------------------------------------------------------------------------
# Helpers
# ---------------------------------------------------------------------------
def _round_up(x, m):
    return ((x + m - 1) // m) * m


def _largest_tile(dim, target):
    """Largest divisor of `dim` that is <= target and a multiple of 8, else
    `dim` itself (full-extent blocks always satisfy the (8,128) rule)."""
    if dim <= target:
        return dim
    for t in range(target, 7, -1):
        if dim % t == 0 and t % 8 == 0:
            return t
    # TODO(synk): pad-and-mask instead of a full-extent fallback for prime-ish
    # dims (a full-S block can exceed the scoped VMEM limit on v7x).
    return dim


# ---------------------------------------------------------------------------
# Kernel 1: fused QKV projection (2-D row grid, lane-dense Q|K slab)
# ---------------------------------------------------------------------------
def _qkv_proj_kernel(x_ref, w_ref, b_ref, qk_ref, v_ref, *, qk_width):
    # x_ref : (tr, H)            rows of the flattened (B*S, H) input
    # w_ref : (H, 2*Hqp + H)     pre-transposed, zero-padded fused weight
    #                            (whole-array VMEM resident, copied once)
    # b_ref : (1, 2*Hqp + H)     fused bias (f32)
    # One wide lane-dense MXU matmul, bias add in f32, then split into the
    # Q|K slab (width 2*Hqp, a multiple of 128 -> unmasked stores) and V.
    x = x_ref[...].astype(w_ref.dtype)
    fused = jnp.dot(x, w_ref[...], preferred_element_type=jnp.float32)
    fused = fused + b_ref[...]
    qk_ref[...] = fused[:, :qk_width].astype(qk_ref.dtype)
    v_ref[...] = fused[:, qk_width:].astype(v_ref.dtype)


# ---------------------------------------------------------------------------
# Kernel 2a: flash-style attention + gamma residual (multi KV tile)
# ---------------------------------------------------------------------------
def _flash_attn_kernel(q_ref, k_ref, v_ref, x_ref, gamma_ref, o_ref,
                       m_scr, l_scr, acc_scr, *, approx_recip):
    ki = pl.program_id(2)

    @pl.when(ki == 0)
    def _init():
        m_scr[...] = jnp.full_like(m_scr, -jnp.inf)
        l_scr[...] = jnp.zeros_like(l_scr)
        acc_scr[...] = jnp.zeros_like(acc_scr)

    q = q_ref[0]                           # (tq, Hqp)
    k = k_ref[0]                           # (tk, Hqp)
    # energy tile (tq, tk): contract the (padded) head dims directly (no k.T).
    s = lax.dot_general(q, k, (((1,), (1,)), ((), ())),
                        preferred_element_type=jnp.float32)

    # Online softmax in f32 (v5e has no bf16 VPU/EUP path).
    m_prev = m_scr[...]
    m_new = jnp.maximum(m_prev, jnp.max(s, axis=-1, keepdims=True))
    alpha = jnp.exp(m_prev - m_new)
    p = jnp.exp(s - m_new)

    l_scr[...] = alpha * l_scr[...] + jnp.sum(p, axis=-1, keepdims=True)
    pv = lax.dot_general(p.astype(v_ref.dtype), v_ref[0],
                         (((1,), (0,)), ((), ())),
                         preferred_element_type=jnp.float32)     # (tq, H)
    acc_scr[...] = alpha * acc_scr[...] + pv
    m_scr[...] = m_new

    @pl.when(ki == pl.num_programs(2) - 1)
    def _finalize():
        gamma = gamma_ref[0, 0]
        inv_l = pl.reciprocal(l_scr[...], approx=approx_recip)
        out = gamma * (acc_scr[...] * inv_l) + x_ref[0].astype(jnp.float32)
        o_ref[0] = out.astype(o_ref.dtype)


# ---------------------------------------------------------------------------
# Kernel 2b: single-KV-tile attention + gamma residual (no scratch, no rescale)
# ---------------------------------------------------------------------------
def _attn_onepass_kernel(q_ref, k_ref, v_ref, x_ref, gamma_ref, o_ref,
                         *, approx_recip):
    q = q_ref[0]                           # (tq, Hqp)
    k = k_ref[0]                           # (S, Hqp)  -- whole KV range
    s = lax.dot_general(q, k, (((1,), (1,)), ((), ())),
                        preferred_element_type=jnp.float32)
    m = jnp.max(s, axis=-1, keepdims=True)
    p = jnp.exp(s - m)
    l = jnp.sum(p, axis=-1, keepdims=True)
    pv = lax.dot_general(p.astype(v_ref.dtype), v_ref[0],
                         (((1,), (0,)), ((), ())),
                         preferred_element_type=jnp.float32)     # (tq, H)
    gamma = gamma_ref[0, 0]
    out = gamma * (pv * pl.reciprocal(l, approx=approx_recip)) \
        + x_ref[0].astype(jnp.float32)
    o_ref[0] = out.astype(o_ref.dtype)


# ---------------------------------------------------------------------------
# Wrapper
# ---------------------------------------------------------------------------
def prepare_self_attn_params(wq, bq, wk, bk, wv, bv, gamma,
                             *, matmul_dtype=jnp.bfloat16):
    """One-time weight prep (hoist this out of the per-call path for repeated
    inference): zero-pad Hq up to a multiple of 128, concat [q|k|v] rows and
    pre-transpose so the kernels never transpose."""
    Hq, H = wq.shape
    Hqp = _round_up(Hq, 128)
    pad = Hqp - Hq
    wq_p = jnp.pad(wq, ((0, pad), (0, 0)))
    wk_p = jnp.pad(wk, ((0, pad), (0, 0)))
    bq_p = jnp.pad(bq, (0, pad))
    bk_p = jnp.pad(bk, (0, pad))
    w_qkv_t = jnp.concatenate([wq_p, wk_p, wv], axis=0).T.astype(matmul_dtype)  # (H, 2*Hqp+H)
    b_qkv = jnp.concatenate([bq_p, bk_p, bv], axis=0).reshape(1, -1).astype(jnp.float32)
    gamma2 = jnp.asarray(gamma).reshape(1, 1).astype(jnp.float32)
    return {"w_qkv_t": w_qkv_t, "b_qkv": b_qkv, "gamma": gamma2,
            "Hq": Hq, "Hqp": Hqp, "matmul_dtype": jnp.dtype(matmul_dtype)}


def self_attn_apply(x, params, *, row_tile=512, q_tile=512, kv_tile=512):
    """x: (B, S, H) -> (B, S, H)."""
    B, S, H = x.shape
    Hqp = params["Hqp"]
    matmul_dtype = params["matmul_dtype"]
    w_qkv_t, b_qkv, gamma2 = params["w_qkv_t"], params["b_qkv"], params["gamma"]
    out_dtype = x.dtype

    qk_w = 2 * Hqp
    Dtot_p = qk_w + H
    bytes_mm = jnp.dtype(matmul_dtype).itemsize
    bytes_x = jnp.dtype(x.dtype).itemsize
    bytes_out = jnp.dtype(out_dtype).itemsize

    # ---------------- Kernel 1: fused QKV projection ----------------
    R = B * S
    x2d = x.reshape(R, H)                         # leading-dim collapse: free
    tr = _largest_tile(R, row_tile)

    est1 = (2 * tr * H * bytes_x                  # x blocks (double-buffered)
            + H * Dtot_p * bytes_mm               # fused weight (single VMEM copy)
            + 8 * Dtot_p * 4                      # bias (single copy, sublane-padded)
            + 2 * tr * qk_w * bytes_mm            # Q|K output blocks
            + 2 * tr * H * bytes_mm               # V output blocks
            + tr * Dtot_p * 4)                    # f32 matmul result temporary
    vmem1 = int(min(2 * est1 + (8 << 20), 64 * 1024 * 1024))

    qk2d, v2d = pl.pallas_call(
        functools.partial(_qkv_proj_kernel, qk_width=qk_w),
        out_shape=(
            jax.ShapeDtypeStruct((R, qk_w), matmul_dtype),
            jax.ShapeDtypeStruct((R, H), matmul_dtype),
        ),
        grid_spec=pltpu.PrefetchScalarGridSpec(
            num_scalar_prefetch=0,
            grid=(R // tr,),
            in_specs=[
                pl.BlockSpec((tr, H), lambda r: (r, 0)),                 # x rows
                pl.BlockSpec(memory_space=pltpu.MemorySpace.VMEM),       # W (copied once)
                pl.BlockSpec(memory_space=pltpu.MemorySpace.VMEM),       # bias (copied once)
            ],
            out_specs=[
                pl.BlockSpec((tr, qk_w), lambda r: (r, 0)),              # Q|K slab
                pl.BlockSpec((tr, H), lambda r: (r, 0)),                 # V slab
            ],
        ),
        compiler_params=pltpu.CompilerParams(
            dimension_semantics=("parallel",),
            vmem_limit_bytes=vmem1),
    )(x2d, w_qkv_t, b_qkv)

    qk = qk2d.reshape(B, S, qk_w)                 # leading-dim split: free
    v = v2d.reshape(B, S, H)

    # ---------------- Kernel 2: attention + gamma residual ----------------
    tq = _largest_tile(S, q_tile)
    tk = _largest_tile(S, kv_tile)
    n_kv = S // tk

    est2 = (2 * tq * Hqp * bytes_mm               # q blocks
            + 2 * tk * Hqp * bytes_mm             # k blocks
            + 2 * tk * H * bytes_mm               # v blocks
            + 2 * tq * H * bytes_x                # x (residual) blocks
            + 2 * tq * H * bytes_out              # output blocks
            + 3 * tq * tk * 4)                    # s / p / rescale f32 temporaries
    if n_kv > 1:
        est2 += tq * H * 4 + 2 * tq * 128 * 4     # acc + m/l scratch (lane-padded)
    vmem2 = int(min(2 * est2 + (8 << 20), 64 * 1024 * 1024))

    approx_recip = bool(jnp.dtype(matmul_dtype) == jnp.dtype(jnp.bfloat16))

    if n_kv == 1:
        # Single-KV-tile specialization: whole softmax row in one pass.
        kernel = functools.partial(_attn_onepass_kernel, approx_recip=approx_recip)
        out = pl.pallas_call(
            kernel,
            out_shape=jax.ShapeDtypeStruct((B, S, H), out_dtype),
            grid_spec=pltpu.PrefetchScalarGridSpec(
                num_scalar_prefetch=0,
                grid=(B, S // tq),
                in_specs=[
                    pl.BlockSpec((1, tq, Hqp), lambda b, qi: (b, qi, 0)),   # Q cols
                    pl.BlockSpec((1, tk, Hqp), lambda b, qi: (b, 0, 1)),    # K cols
                    pl.BlockSpec((1, tk, H), lambda b, qi: (b, 0, 0)),      # V
                    pl.BlockSpec((1, tq, H), lambda b, qi: (b, qi, 0)),     # x residual
                    pl.BlockSpec(memory_space=pltpu.MemorySpace.SMEM),      # gamma
                ],
                out_specs=pl.BlockSpec((1, tq, H), lambda b, qi: (b, qi, 0)),
            ),
            compiler_params=pltpu.CompilerParams(
                dimension_semantics=("parallel", "parallel"),
                vmem_limit_bytes=vmem2),
        )(qk, qk, v, x, gamma2)
    else:
        kernel = functools.partial(_flash_attn_kernel, approx_recip=approx_recip)
        out = pl.pallas_call(
            kernel,
            out_shape=jax.ShapeDtypeStruct((B, S, H), out_dtype),
            grid_spec=pltpu.PrefetchScalarGridSpec(
                num_scalar_prefetch=0,
                grid=(B, S // tq, n_kv),                 # kv reduction axis last
                in_specs=[
                    pl.BlockSpec((1, tq, Hqp), lambda b, qi, ki: (b, qi, 0)),  # Q cols
                    pl.BlockSpec((1, tk, Hqp), lambda b, qi, ki: (b, ki, 1)),  # K cols
                    pl.BlockSpec((1, tk, H), lambda b, qi, ki: (b, ki, 0)),    # V
                    pl.BlockSpec((1, tq, H), lambda b, qi, ki: (b, qi, 0)),    # x residual
                    pl.BlockSpec(memory_space=pltpu.MemorySpace.SMEM),         # gamma
                ],
                out_specs=pl.BlockSpec((1, tq, H), lambda b, qi, ki: (b, qi, 0)),
                scratch_shapes=[
                    pltpu.VMEM((tq, 1), jnp.float32),    # running max m
                    pltpu.VMEM((tq, 1), jnp.float32),    # running denom l
                    pltpu.VMEM((tq, H), jnp.float32),    # output accumulator
                ],
            ),
            compiler_params=pltpu.CompilerParams(
                dimension_semantics=("parallel", "parallel", "arbitrary"),
                vmem_limit_bytes=vmem2),
        )(qk, qk, v, x, gamma2)

    return out


def self_attn(x, wq, bq, wk, bk, wv, bv, gamma, *, matmul_dtype=jnp.bfloat16,
              row_tile=512, q_tile=512, kv_tile=512):
    """Pallas implementation of Self_Attn.forward.  x: (B, S, H) -> (B, S, H).
    For repeated inference, call prepare_self_attn_params once and
    self_attn_apply per step (hoists the weight pad/concat/transpose)."""
    params = prepare_self_attn_params(wq, bq, wk, bk, wv, bv, gamma,
                                      matmul_dtype=matmul_dtype)
    return self_attn_apply(x, params, row_tile=row_tile, q_tile=q_tile,
                           kv_tile=kv_tile)


def self_attn_ref(x, wq, bq, wk, bk, wv, bv, gamma):
    """Pure-JAX reference matching the PyTorch forward exactly (full f32)."""
    hp = lax.Precision.HIGHEST
    q = jnp.dot(x, wq.T, precision=hp) + bq
    k = jnp.dot(x, wk.T, precision=hp) + bk
    v = jnp.dot(x, wv.T, precision=hp) + bv
    energy = jnp.einsum("bsd,btd->bst", q, k, precision=hp)
    attn = jax.nn.softmax(energy, axis=-1)
    out = jnp.einsum("bst,bth->bsh", attn, v, precision=hp)
    return gamma[0] * out + x


if __name__ == "__main__":
    def make_inputs(key, B, S, H):
        kx, kq, kbq, kk, kbk, kv_, kbv = jax.random.split(key, 7)
        x = jax.random.normal(kx, (B, S, H), dtype=jnp.float32)
        lim = 1.0 / (H ** 0.5)
        wq = jax.random.uniform(kq, (H // 8, H), jnp.float32, -lim, lim)
        bq = jax.random.uniform(kbq, (H // 8,), jnp.float32, -lim, lim)
        wk = jax.random.uniform(kk, (H // 8, H), jnp.float32, -lim, lim)
        bk = jax.random.uniform(kbk, (H // 8,), jnp.float32, -lim, lim)
        wv = jax.random.uniform(kv_, (H, H), jnp.float32, -lim, lim)
        bv = jax.random.uniform(kbv, (H,), jnp.float32, -lim, lim)
        return x, wq, bq, wk, bk, wv, bv

    key = jax.random.PRNGKey(0)
    k_small, k_med = jax.random.split(key)

    gamma0 = jnp.zeros((1,), dtype=jnp.float32)        # module init (gamma = 0)
    gamma1 = jnp.full((1,), 0.7, dtype=jnp.float32)    # exercises attention path

    # ---- Small shape (B=2, S=8, H=32): single-KV-tile one-pass kernel ----
    small = make_inputs(k_small, 2, 8, 32)
    x_s = small[0]
    ref_s = self_attn_ref(*small, gamma1)

    out_f32 = jax.block_until_ready(
        self_attn(*small, gamma1, matmul_dtype=jnp.float32))
    assert out_f32.shape == x_s.shape
    assert jnp.allclose(out_f32, ref_s, atol=1e-4, rtol=1e-4)

    out_bf16 = jax.block_until_ready(self_attn(*small, gamma1))
    assert jnp.allclose(out_bf16, ref_s, atol=5e-2, rtol=5e-2)

    out_init = jax.block_until_ready(self_attn(*small, gamma0))
    assert jnp.allclose(out_init, x_s, atol=1e-6, rtol=1e-6)

    # ---- Medium shape (B=2, S=1024, H=64): multi-KV-tile flash path ----
    med = make_inputs(k_med, 2, 1024, 64)
    ref_m = self_attn_ref(*med, gamma1)

    out_m_f32 = jax.block_until_ready(
        self_attn(*med, gamma1, matmul_dtype=jnp.float32))
    assert jnp.allclose(out_m_f32, ref_m, atol=2e-4, rtol=2e-4)

    out_m_bf16 = jax.block_until_ready(self_attn(*med, gamma1))
    assert jnp.allclose(out_m_bf16, ref_m, atol=5e-2, rtol=5e-2)

    print("KERNEL_OK")
</pallas_src>

<mosaic_0001>
module attributes {stable_mosaic.version = 11 : i64} {
  func.func @_qkv_proj_kernel(%arg0: i32, %arg1: memref<16x32xf32, #tpu.memory_space<vmem>>, %arg2: memref<32x288xf32, #tpu.memory_space<vmem>>, %arg3: memref<1x288xf32, #tpu.memory_space<vmem>>, %arg4: memref<16x256xf32, #tpu.memory_space<vmem>>, %arg5: memref<16x32xf32, #tpu.memory_space<vmem>>) attributes {dimension_semantics = [#tpu.dimension_semantics<parallel>], iteration_bounds = array<i64: 1>, scalar_prefetch = 0 : i64, scratch_operands = 0 : i64, tpu.core_type = #tpu.core_type<tc>, window_params = [{transform_indices = @transform_0, window_bounds = array<i64: 16, 32>}, {pipeline_mode = #tpu.pipeline_mode<synchronous>, transform_indices = @transform_1, window_bounds = array<i64: 32, 288>}, {pipeline_mode = #tpu.pipeline_mode<synchronous>, transform_indices = @transform_2, window_bounds = array<i64: 1, 288>}, {transform_indices = @transform_3, window_bounds = array<i64: 16, 256>}, {transform_indices = @transform_4, window_bounds = array<i64: 16, 32>}]} {
    %c0 = arith.constant 0 : index
    %c0_0 = arith.constant 0 : index
    %0 = vector.load %arg1[%c0, %c0_0] : memref<16x32xf32, #tpu.memory_space<vmem>>, vector<16x32xf32>
    %c0_1 = arith.constant 0 : index
    %c0_2 = arith.constant 0 : index
    %1 = vector.load %arg2[%c0_1, %c0_2] : memref<32x288xf32, #tpu.memory_space<vmem>>, vector<32x288xf32>
    %cst = arith.constant dense<0.000000e+00> : vector<16x288xf32>
    %2 = tpu.matmul %0, %1, %cst {dimension_numbers = #tpu.dot_dimension_numbers<[1], [0], [0], [1], [0, 0, 1, 1], [], []>} : vector<16x32xf32>, vector<32x288xf32>, vector<16x288xf32> -> vector<16x288xf32>
    %c0_3 = arith.constant 0 : index
    %c0_4 = arith.constant 0 : index
    %3 = vector.load %arg3[%c0_3, %c0_4] : memref<1x288xf32, #tpu.memory_space<vmem>>, vector<1x288xf32>
    %4 = vector.broadcast %3 : vector<1x288xf32> to vector<16x288xf32>
    %5 = arith.addf %2, %4 : vector<16x288xf32>
    %6 = vector.extract_strided_slice %5 {offsets = [0, 0], sizes = [16, 256], strides = [1, 1]} : vector<16x288xf32> to vector<16x256xf32>
    %c0_5 = arith.constant 0 : index
    %c0_6 = arith.constant 0 : index
    %7 = vector.load %arg4[%c0_5, %c0_6] : memref<16x256xf32, #tpu.memory_space<vmem>>, vector<16x256xf32>
    tpu.vector_store %arg4[%c0_5, %c0_6], %6 {strides = array<i32>} : memref<16x256xf32, #tpu.memory_space<vmem>>, vector<16x256xf32>,
    %8 = vector.extract_strided_slice %5 {offsets = [0, 256], sizes = [16, 32], strides = [1, 1]} : vector<16x288xf32> to vector<16x32xf32>
    %c0_7 = arith.constant 0 : index
    %c0_8 = arith.constant 0 : index
    %9 = vector.load %arg5[%c0_7, %c0_8] : memref<16x32xf32, #tpu.memory_space<vmem>>, vector<16x32xf32>
    tpu.vector_store %arg5[%c0_7, %c0_8], %8 {strides = array<i32>} : memref<16x32xf32, #tpu.memory_space<vmem>>, vector<16x32xf32>,
    return
  }
  func.func @transform_0(%arg0: i32) -> (i32, i32) {
    %c0_i32 = arith.constant 0 : i32
    %c0_i32_0 = arith.constant 0 : i32
    return %arg0, %c0_i32 : i32, i32
  }
  func.func @transform_1(%arg0: i32) -> (i32, i32) {
    %c0_i32 = arith.constant 0 : i32
    %c0_i32_0 = arith.constant 0 : i32
    %c0_i32_1 = arith.constant 0 : i32
    return %c0_i32, %c0_i32_0 : i32, i32
  }
  func.func @transform_2(%arg0: i32) -> (i32, i32) {
    %c0_i32 = arith.constant 0 : i32
    %c0_i32_0 = arith.constant 0 : i32
    %c0_i32_1 = arith.constant 0 : i32
    return %c0_i32, %c0_i32_0 : i32, i32
  }
  func.func @transform_3(%arg0: i32) -> (i32, i32) {
    %c0_i32 = arith.constant 0 : i32
    %c0_i32_0 = arith.constant 0 : i32
    return %arg0, %c0_i32 : i32, i32
  }
  func.func @transform_4(%arg0: i32) -> (i32, i32) {
    %c0_i32 = arith.constant 0 : i32
    %c0_i32_0 = arith.constant 0 : i32
    return %arg0, %c0_i32 : i32, i32
  }
}

</mosaic_0001>

<bundles_post_ra>
// kernel: tpu_custom_call.1
= control target key start
LH: loop header
LB: loop body
LE: loop exit
PB: predicated region body
PF: predicated region fallthrough
CT: control target
= control target key end

     0   :  { %10 = vsyncpa [#allocation3], 0  ;;  %s419_s0 = inlined_call_operand.hbm [shape: f32[16,32], index: 0, kind: input, shape index: {}]   ;;  %s420_s1 = inlined_call_operand.hbm [shape: f32[32,288], index: 1, kind: input, shape index: {}]   ;;  %s421_s2 = inlined_call_operand.hbm [shape: f32[1,288], index: 2, kind: input, shape index: {}]   ;;  %s422_s3 = inlined_call_operand.hbm [shape: f32[16,256], index: 3, kind: output, shape index: {0}]   ;;  %s423_s4 = inlined_call_operand.hbm [shape: f32[16,32], index: 4, kind: output, shape index: {1}]  }
   0x1   :  { %11 = vsyncpa [#allocation6], 0 }
   0x2   :  { %12 = vsyncpa [#allocation4], 0  ;;  %s31_s17 = sshll.u32 %s420_s1, 4  ;;  %s32_s17 = int_to_ptr.hbm [resolvable:$true] %s31_s17 }
   0x3   :  { %13 = vsyncpa [#allocation10], 0  ;;  %s354_s18 = smov [#allocation5]   ;;  %s18_s22 = sshll.u32 %s419_s0, 4  ;;  %s19_s22 = int_to_ptr.hbm [resolvable:$true] %s18_s22 }
   0x4   :  { %s33_s19 = sshll.u32 %s354_s18, 4  ;;  %s355_s23 = smov 384   ;;  %s34_s19 = int_to_ptr.vmem [resolvable:$true] %s33_s19 }
   0x5   :  { %s356_s24 = smov 24   ;;  %s357_s25 = smov [#allocation2]  }
   0x6   :  { %39 = dma.hbm_to_vmem [thread:$0]  %s32_s17, 1536, %s34_s19, [#allocation6], %s355_s23, %s355_s23, %s356_s24  }
   0x7   :  { %s20_s26 = sshll.u32 %s357_s25, 4  ;;  %s358_s27 = smov 128   ;;  %s21_s26 = int_to_ptr.vmem [resolvable:$true] %s20_s26 }
   0x8   :  { %s359_s28 = smov 8   ;;  %s45_s30 = sshll.u32 %s421_s2, 4  ;;  %s46_s30 = int_to_ptr.hbm [resolvable:$true] %s45_s30 }
   0x9   :  { %26 = dma.hbm_to_vmem [thread:$0]  %s19_s22, 256, %s21_s26, [#allocation3], %s358_s27, %s358_s27, %s359_s28  }
   0xa   :  { %s360_s5 = smov [#allocation7]  }
   0xb   :  { %s47_s0 = sshll.u32 %s360_s5, 4  ;;  %s48_s0 = int_to_ptr.vmem [resolvable:$true] %s47_s0 }
   0xc   :  { %50 = dma.hbm_to_vmem [thread:$0]  %s46_s30, 48, %s48_s0, [#allocation6]  }
   0xd   :  { %346 = dma.done.wait [#allocation3], 256  }
   0xe   :  { %347 = vsyncadd [#allocation3], 4294967040 }
   0xf   :  { %348 = dma.done.wait [#allocation6], 1584  }
  0x10   :  { %349 = vsyncadd [#allocation6], 4294965712  ;;  %v76_v0 = vld [vmem:[#allocation5 + $0x58] sm:$0xff]  ;;  %v73_v1 = vld [vmem:[#allocation5 + $0x40] sm:$0xff]  ;;  %vm85_vm0 = vcmask 261120   ;;  %s361_s2 = smov [#allocation8]  }
  0x11   :  { %150 = vmatpush.msra.mxu2 %v76_v0  ;;  %v70_v2 = vld [vmem:[#allocation5 + $0x28] sm:$0xff]  ;;  %v75_v3 = vld [vmem:[#allocation5 + $0x50] sm:$0xff]  ;;  %v72_v5 = vld [vmem:[#allocation5 + $0x38] sm:$0xff]  ;;  %s171_s6 = sshll.u32 %s361_s2, 4  ;;  %s173_s9 = sshll.u32 %s422_s3, 4  ;;  %s172_s6 = int_to_ptr.vmem [resolvable:$true] %s171_s6  ;;  %s174_s9 = int_to_ptr.hbm [resolvable:$true] %s173_s9 }
  0x12   :  { %127 = vmatpush.msra.mxu1 %v75_v3  ;;  %v74_v4 = vld [vmem:[#allocation5 + $0x48] sm:$0xff]  ;;  %v71_v6 = vld [vmem:[#allocation5 + $0x30] sm:$0xff]  ;;  %v69_v7 = vld [vmem:[#allocation5 + $0x20] sm:$0xff]  ;;  %s362_s10 = smov [#allocation9]   ;;  %s186_s14 = sshll.u32 %s423_s4, 4  ;;  %s187_s14 = int_to_ptr.hbm [resolvable:$true] %s186_s14 }
  0x13   :  { %151 = vmatpush.msra.mxu2 %v73_v1  ;;  %211 = vmatpush.msra.mxu3 %v74_v4  ;;  %v67_v8 = vld [vmem:[#allocation5 + $0x10] sm:$0xff]  ;;  %v68_v9 = vld [vmem:[#allocation5 + $0x18] sm:$0xff]  ;;  %v66_v11 = vld [vmem:[#allocation5 + $0x8] sm:$0xff]  ;;  %s184_s11 = sshll.u32 %s362_s10, 4  ;;  %s363_s15 = smov 256   ;;  %s185_s11 = int_to_ptr.vmem [resolvable:$true] %s184_s11 }
  0x14   :  { %128 = vmatpush.msra.mxu1 %v72_v5  ;;  %104 = vmatpush.msra.mxu0 %v74_v4  ;;  %v63_v10 = vld [vmem:[#allocation2] sm:$0xff]  ;;  %v65_v12 = vld [vmem:[#allocation5] sm:$0xff]  ;;  %v64_v13 = vld [vmem:[#allocation2 + $0x8] sm:$0xff]  ;;  %s364_s3 = smov 16  }
  0x15   :  { %152 = vmatpush.msra.mxu2 %v70_v2  ;;  %212 = vmatpush.msra.mxu3 %v71_v6  ;;  %v77_v14 = vld [vmem:[#allocation7] sm:$0x7] }
  0x16   :  { %129 = vmatpush.msra.mxu1 %v69_v7  ;;  %105 = vmatpush.msra.mxu0 %v71_v6  ;;  %v80_v15 = vperm.slane %v77_v14, 1  ;;  %v79_v18 = vperm.slane %v77_v14, 0  ;;  %v81_v19 = vperm.slane %v77_v14, 2 }
  0x17   :  { %153 = vmatpush.msra.mxu2 %v67_v8  ;;  %213 = vmatpush.msra.mxu3 %v68_v9 }
  0x18   :  { %209 = vmatmul.msk.f32.vlgmr.msra.gmra.mxu2 %vm85_vm0, %v63_v10  ;;  %130 = vmatpush.msra.mxu1 %v66_v11 }
  0x19   :  { %207 = vmatmul.msk.f32.vlgmr.msra.gmra.mxu1 %vm85_vm0, %v63_v10  ;;  %214 = vmatpush.msra.mxu3 %v65_v12 }
  0x1a   :  { %206 = vmatmul.msk.f32.vlgmr.msra.gmra.mxu3 %vm85_vm0, %v64_v13  ;;  %106 = vmatpush.msra.mxu0 %v68_v9 }
  0x1c   :  { %107 = vmatpush.msra.mxu0 %v65_v12 }
  0x1d   :  { %205 = vmatmul.msk.f32.vlgmr.msra.gmra.mxu0 %vm85_vm0, %v63_v10 }
  0x20   :  { %210 = vmatmul.msk.f32.gmra.mxu2 %vm85_vm0, %v64_v13 }
  0x21   :  { %208 = vmatmul.msk.f32.gmra.mxu1 %vm85_vm0, %v64_v13 }
  0x96   :  { %v132_v16 = vpop.f32.mrf.mxu1 }
  0x97   :  { %v133_v17 = vadd.f32 %v132_v16, %v80_v15 }
  0x99   :  { %162 = vst [vmem:[#allocation8 + $0x8] sm:$0xff] %v133_v17 }
  0x9a   :  { %v109_v20 = vpop.f32.mrf.mxu0 }
  0x9b   :  { %v155_v21 = vpop.f32.mrf.mxu2  ;;  %v110_v22 = vadd.f32 %v109_v20, %v79_v18 }
  0x9c   :  { %v156_v23 = vadd.f32 %v155_v21, %v81_v19 }
  0x9d   :  { %161 = vst [vmem:[#allocation8] sm:$0xff] %v110_v22  ;;  %v112_v24 = vpop.f32.mrf.mxu3 }
  0x9e   :  { %165 = vst.msk [vmem:[#allocation9] sm:$0xff] %vm85_vm0, %v156_v23  ;;  %v113_v25 = vadd.f32 %v112_v24, %v79_v18  ;;  %v135_v26 = vpop.f32.mrf.mxu1 }
  0x9f   :  { %v136_v27 = vadd.f32 %v135_v26, %v80_v15 }
  0xa0   :  { %163 = vst [vmem:[#allocation8 + $0x10] sm:$0xff] %v113_v25 }
  0xa1   :  { %164 = vst [vmem:[#allocation8 + $0x18] sm:$0xff] %v136_v27 }
  0xa2   :  { %179 = dma.vmem_to_hbm [thread:$0]  %s172_s6, 512, %s174_s9, [#allocation4], %s363_s15, %s363_s15, %s364_s3  }
  0xa3   :  { %v158_v28 = vpop.f32.mrf.mxu2 }
  0xa4   :  { %v159_v29 = vadd.f32 %v158_v28, %v81_v19 }
  0xa6   :  { %166 = vst.msk [vmem:[#allocation9 + $0x8] sm:$0xff] %vm85_vm0, %v159_v29 }
  0xa7   :  { %192 = dma.vmem_to_hbm [thread:$0]  %s185_s11, 256, %s187_s14, [#allocation10], %s358_s27, %s358_s27, %s359_s28  }
  0xa8   :  { %350 = dma.done.wait [#allocation4], 512  }
  0xa9   :  { %351 = vsyncadd [#allocation4], 4294966784 }
  0xaa   :  { %352 = dma.done.wait [#allocation10], 256  }
  0xab   :  { %353 = vsyncadd [#allocation10], 4294967040 }
  0xac   :  { %201 = vsyncpa [#allocation3], 1 }
  0xad   :  { %202 = vsyncpa [#allocation6], 1 }
  0xae   :  { %203 = vsyncpa [#allocation4], 1 }
  0xaf   :  { %204 = vsyncpa [#allocation10], 1 }

</bundles_post_ra>
